<compile_context>
chip_gen: v5e
topology: v5e:2x2
jax: 0.10.0
libtpu: 0.0.40
codegen_flags: <defaults>
</compile_context>

<pallas_src>
import functools

import jax
import jax.numpy as jnp
from jax.experimental import pallas as pl
from jax.experimental.pallas import tpu as pltpu

_LANE = 128
_INV_LN2 = 1.4426950408889634  # 1 / ln(2); log2(1+x) == log1p(x) * _INV_LN2


def _minmax_kernel(x_ref, mn_ref, mx_ref, *, tile_rows, valid_rows, mask_tail):
    """Per-tile partial min/max of raw x (f32), broadcast into an (8,128) slab."""
    x = x_ref[...].astype(jnp.float32)
    if mask_tail:
        t = pl.program_id(0)
        row = jax.lax.broadcasted_iota(jnp.int32, x.shape, 0) + t * tile_rows
        ok = row < valid_rows
        x_min_src = jnp.where(ok, x, jnp.inf)
        x_max_src = jnp.where(ok, x, -jnp.inf)
    else:
        x_min_src = x
        x_max_src = x
    # Reduce only across rows (VPU-friendly); the tiny cross-lane reduction is
    # finished outside the kernel on the (num_tiles, 8, 128) partials.
    mn_ref[...] = jnp.broadcast_to(jnp.min(x_min_src, axis=0), mn_ref.shape)
    mx_ref[...] = jnp.broadcast_to(jnp.max(x_max_src, axis=0), mx_ref.shape)


def _normalize_kernel(params_ref, x_ref, o_ref):
    """o = log1p(x) * a + b  with a, b read once per tile from SMEM."""
    a = params_ref[0]
    b = params_ref[1]
    y = jnp.log1p(x_ref[...].astype(jnp.float32))
    o_ref[...] = (y * a + b).astype(o_ref.dtype)


def _pick_tiling(rows, itemsize):
    """Generation-gated tile size + scoped-VMEM limit."""
    try:
        vmem_bytes = pltpu.get_tpu_info().vmem_capacity_bytes
    except Exception:
        vmem_bytes = 64 * 1024 * 1024  # assume the smaller (v7x-like) budget
    if vmem_bytes >= 100 * 1024 * 1024:      # v5e / v6e: 128 MiB VMEM per TC
        target_bytes = 8 * 1024 * 1024       # 8 MiB per buffer
        vmem_limit = 96 * 1024 * 1024
    else:                                    # v7x: 64 MiB VMEM per TC
        target_bytes = 4 * 1024 * 1024       # 4 MiB per buffer
        vmem_limit = 48 * 1024 * 1024
    target_rows = max(8, (target_bytes // (_LANE * itemsize)) // 8 * 8)
    rows_up8 = -(-rows // 8) * 8
    tile_rows = max(8, min(target_rows, rows_up8))
    return tile_rows, vmem_limit


def log_corr_x(x, gain=2.5):
    """gain*log2(1+x) followed by global min-max normalization to [0, 1]."""
    orig_shape = x.shape
    orig_dtype = x.dtype
    itemsize = jnp.dtype(orig_dtype).itemsize

    flat = x.reshape(-1)
    n = flat.shape[0]

    padded = n % _LANE != 0
    if padded:
        # Rare fallback: pad to a lane multiple with an existing element so the
        # global min/max is unaffected. (Common shapes hit the no-copy path.)
        total = (-(-n // _LANE)) * _LANE
        fill = jnp.broadcast_to(flat[0], (total - n,)).astype(orig_dtype)
        flat = jnp.concatenate([flat, fill], axis=0)

    rows = flat.shape[0] // _LANE
    x2d = flat.reshape(rows, _LANE)

    tile_rows, vmem_limit = _pick_tiling(rows, itemsize)
    num_tiles = -(-rows // tile_rows)                  # cdiv; last block may be partial
    mask_tail = (rows % tile_rows) != 0

    # ---- Pass 1: per-tile partial min/max of x (parallel across tiles/TCs) ----
    reduce_kernel = functools.partial(
        _minmax_kernel, tile_rows=tile_rows, valid_rows=rows, mask_tail=mask_tail)

    pmin, pmax = pl.pallas_call(
        reduce_kernel,
        out_shape=(jax.ShapeDtypeStruct((num_tiles, 8, _LANE), jnp.float32),
                   jax.ShapeDtypeStruct((num_tiles, 8, _LANE), jnp.float32)),
        grid_spec=pltpu.PrefetchScalarGridSpec(
            num_scalar_prefetch=0,
            grid=(num_tiles,),
            in_specs=[pl.BlockSpec((tile_rows, _LANE), lambda t: (t, 0))],
            out_specs=[pl.BlockSpec((1, 8, _LANE), lambda t: (t, 0, 0)),
                       pl.BlockSpec((1, 8, _LANE), lambda t: (t, 0, 0))],
        ),
        compiler_params=pltpu.CompilerParams(
            dimension_semantics=("parallel",),
            vmem_limit_bytes=vmem_limit,
        ),
    )(x2d)

    xmin = jnp.min(pmin)
    xmax = jnp.max(pmax)

    # Fold gain, 1/ln2 and the min-max normalization into one scale/offset pair.
    # jnp.minimum/maximum handles gain < 0 (monotone decreasing) correctly.
    c1 = (gain * _INV_LN2) * jnp.log1p(xmin)
    c2 = (gain * _INV_LN2) * jnp.log1p(xmax)
    lo = jnp.minimum(c1, c2)
    hi = jnp.maximum(c1, c2)
    # Match the PyTorch module exactly: constant input (hi == lo) -> NaN.
    s = 1.0 / (hi - lo)
    a = (gain * _INV_LN2) * s
    b = -lo * s
    params = jnp.stack([a, b]).astype(jnp.float32)

    # ---- Pass 2: normalize + write (parallel across tiles/TCs) ----
    out2d = pl.pallas_call(
        _normalize_kernel,
        out_shape=jax.ShapeDtypeStruct((rows, _LANE), orig_dtype),
        grid_spec=pltpu.PrefetchScalarGridSpec(
            num_scalar_prefetch=1,
            grid=(num_tiles,),
            in_specs=[pl.BlockSpec((tile_rows, _LANE), lambda t, prm: (t, 0))],
            out_specs=pl.BlockSpec((tile_rows, _LANE), lambda t, prm: (t, 0)),
        ),
        compiler_params=pltpu.CompilerParams(
            dimension_semantics=("parallel",),
            vmem_limit_bytes=vmem_limit,
        ),
    )(params, x2d)

    out = out2d.reshape(-1)
    if padded:
        out = out[:n]
    return out.reshape(orig_shape)


def log_corr(t, gain=2.5):
    """Mirror of LogCorr.forward: operates on a tuple, transforms t[0]."""
    l = list(t)
    l[0] = log_corr_x(l[0], gain=gain)
    return tuple(l)


if __name__ == "__main__":
    key = jax.random.PRNGKey(0)
    k0, k1 = jax.random.split(key)

    # Image-like NCHW input in [0, 1) (adjust_log expects values > -1).
    x = jax.random.uniform(k0, (2, 4, 16, 16), dtype=jnp.float32)
    # A second passthrough tuple element (e.g. a label tensor).
    y = jax.random.normal(k1, (2, 16, 16), dtype=jnp.float32)

    gain = 2.5
    out = log_corr((x, y), gain=gain)
    out = jax.block_until_ready(out)

    # Reference semantics in plain JAX.
    ref_y = gain * jnp.log2(1.0 + x)
    ref = (ref_y - ref_y.min()) / (ref_y.max() - ref_y.min())

    assert out[0].shape == x.shape and out[0].dtype == x.dtype
    assert jnp.allclose(out[0], ref, atol=1e-5, rtol=1e-5), "log-corr mismatch"
    assert jnp.array_equal(out[1], y), "passthrough element modified"

    print("KERNEL_OK")
</pallas_src>

<mosaic_0001>
module attributes {stable_mosaic.version = 11 : i64} {
  func.func @_minmax_kernel(%arg0: i32, %arg1: memref<16x128xf32, #tpu.memory_space<vmem>>, %arg2: memref<1x8x128xf32, #tpu.memory_space<vmem>>, %arg3: memref<1x8x128xf32, #tpu.memory_space<vmem>>) attributes {dimension_semantics = [#tpu.dimension_semantics<parallel>], iteration_bounds = array<i64: 1>, scalar_prefetch = 0 : i64, scratch_operands = 0 : i64, tpu.core_type = #tpu.core_type<tc>, window_params = [{transform_indices = @transform_0, window_bounds = array<i64: 16, 128>}, {transform_indices = @transform_1, window_bounds = array<i64: 1, 8, 128>}, {transform_indices = @transform_2, window_bounds = array<i64: 1, 8, 128>}]} {
    %c0 = arith.constant 0 : index
    %c0_0 = arith.constant 0 : index
    %0 = vector.load %arg1[%c0, %c0_0] : memref<16x128xf32, #tpu.memory_space<vmem>>, vector<16x128xf32>
    %cst = arith.constant dense<0x7F800000> : vector<128xf32>
    %1 = vector.multi_reduction <minimumf>, %0, %cst [0] : vector<16x128xf32> to vector<128xf32>
    %2 = vector.shape_cast %1 : vector<128xf32> to vector<1x1x128xf32>
    %3 = vector.broadcast %2 : vector<1x1x128xf32> to vector<1x8x128xf32>
    %c0_1 = arith.constant 0 : index
    %c0_2 = arith.constant 0 : index
    %c0_3 = arith.constant 0 : index
    %4 = vector.load %arg2[%c0_1, %c0_2, %c0_3] : memref<1x8x128xf32, #tpu.memory_space<vmem>>, vector<1x8x128xf32>
    tpu.vector_store %arg2[%c0_1, %c0_2, %c0_3], %3 {strides = array<i32>} : memref<1x8x128xf32, #tpu.memory_space<vmem>>, vector<1x8x128xf32>,
    %cst_4 = arith.constant dense<0xFF800000> : vector<128xf32>
    %5 = vector.multi_reduction <maximumf>, %0, %cst_4 [0] : vector<16x128xf32> to vector<128xf32>
    %6 = vector.shape_cast %5 : vector<128xf32> to vector<1x1x128xf32>
    %7 = vector.broadcast %6 : vector<1x1x128xf32> to vector<1x8x128xf32>
    %c0_5 = arith.constant 0 : index
    %c0_6 = arith.constant 0 : index
    %c0_7 = arith.constant 0 : index
    %8 = vector.load %arg3[%c0_5, %c0_6, %c0_7] : memref<1x8x128xf32, #tpu.memory_space<vmem>>, vector<1x8x128xf32>
    tpu.vector_store %arg3[%c0_5, %c0_6, %c0_7], %7 {strides = array<i32>} : memref<1x8x128xf32, #tpu.memory_space<vmem>>, vector<1x8x128xf32>,
    return
  }
  func.func @transform_0(%arg0: i32) -> (i32, i32) {
    %c0_i32 = arith.constant 0 : i32
    %c0_i32_0 = arith.constant 0 : i32
    return %arg0, %c0_i32 : i32, i32
  }
  func.func @transform_1(%arg0: i32) -> (i32, i32, i32) {
    %c0_i32 = arith.constant 0 : i32
    %c0_i32_0 = arith.constant 0 : i32
    %c0_i32_1 = arith.constant 0 : i32
    return %arg0, %c0_i32, %c0_i32_0 : i32, i32, i32
  }
  func.func @transform_2(%arg0: i32) -> (i32, i32, i32) {
    %c0_i32 = arith.constant 0 : i32
    %c0_i32_0 = arith.constant 0 : i32
    %c0_i32_1 = arith.constant 0 : i32
    return %arg0, %c0_i32, %c0_i32_0 : i32, i32, i32
  }
}

</mosaic_0001>

<bundles_post_ra>
// kernel: tpu_custom_call.1
= control target key start
LH: loop header
LB: loop body
LE: loop exit
PB: predicated region body
PF: predicated region fallthrough
CT: control target
= control target key end

     0   :  { %8 = vsyncpa [#allocation3], 0  ;;  %s191_s0 = inlined_call_operand.hbm [shape: f32[16,128], index: 0, kind: input, shape index: {}]   ;;  %s192_s1 = inlined_call_operand.hbm [shape: f32[1,8,128], index: 1, kind: output, shape index: {0}]   ;;  %s193_s2 = inlined_call_operand.hbm [shape: f32[1,8,128], index: 2, kind: output, shape index: {1}]  }
   0x1   :  { %9 = vsyncpa [#allocation4], 0 }
   0x2   :  { %10 = vsyncpa [#allocation7], 0  ;;  %s15_s11 = sshll.u32 %s191_s0, 4  ;;  %s162_s12 = smov [#allocation2]   ;;  %s16_s11 = int_to_ptr.hbm [resolvable:$true] %s15_s11 }
   0x3   :  { %s17_s13 = sshll.u32 %s162_s12, 4  ;;  %s163_s14 = smov 128   ;;  %s18_s13 = int_to_ptr.vmem [resolvable:$true] %s17_s13 }
   0x4   :  { %s164_s15 = smov 8  }
   0x5   :  { %23 = dma.hbm_to_vmem [thread:$0]  %s16_s11, 256, %s18_s13, [#allocation3], %s163_s14, %s163_s14, %s164_s15  }
   0x6   :  { %156 = dma.done.wait [#allocation3], 256  }
   0x7   :  { %157 = vsyncadd [#allocation3], 4294967040  ;;  %v28_v0 = vld [vmem:[#allocation2] sm:$0xff]  ;;  %v29_v1 = vld [vmem:[#allocation2 + $0x8] sm:$0xff]  ;;  %s165_s0 = smov [#allocation5]   ;;  %s53_s19 = sshll.u32 %s192_s1, 4  ;;  %s54_s19 = int_to_ptr.hbm [resolvable:$true] %s53_s19 }
   0x8   :  { %v30_v2 = vmin.f32 %v28_v0, %v29_v1  ;;  %v38_v3 = vmax.f32 %v28_v0, %v29_v1  ;;  %s51_s16 = sshll.u32 %s165_s0, 4  ;;  %s166_s20 = smov [#allocation6]   ;;  %s52_s16 = int_to_ptr.vmem [resolvable:$true] %s51_s16 }
   0x9   :  { %s62_s21 = sshll.u32 %s166_s20, 4  ;;  %s64_s24 = sshll.u32 %s193_s2, 4  ;;  %s63_s21 = int_to_ptr.vmem [resolvable:$true] %s62_s21  ;;  %s65_s24 = int_to_ptr.hbm [resolvable:$true] %s64_s24 }
   0xa   :  { %v31_v4 = vrot.slane %v30_v2, 4  ;;  %v39_v5 = vrot.slane %v38_v3, 4 }
   0xc   :  { %v32_v6 = vmin.f32 %v30_v2, %v31_v4  ;;  %v40_v7 = vmax.f32 %v38_v3, %v39_v5 }
   0xe   :  { %v33_v8 = vrot.slane %v32_v6, 2  ;;  %v41_v9 = vrot.slane %v40_v7, 2 }
  0x10   :  { %v34_v10 = vmin.f32 %v32_v6, %v33_v8  ;;  %v42_v11 = vmax.f32 %v40_v7, %v41_v9 }
  0x12   :  { %v35_v12 = vrot.slane %v34_v10, 1  ;;  %v43_v13 = vrot.slane %v42_v11, 1 }
  0x14   :  { %v36_v14 = vmin.f32 %v34_v10, %v35_v12  ;;  %v44_v15 = vmax.f32 %v42_v11, %v43_v13 }
  0x16   :  { %37 = vst [vmem:[#allocation5] sm:$0xff] %v36_v14 }
  0x17   :  { %45 = vst [vmem:[#allocation6] sm:$0xff] %v44_v15  ;;  %56 = dma.vmem_to_hbm [thread:$0]  %s52_s16, 128, %s54_s19, [#allocation4]  }
  0x18   :  { %67 = dma.vmem_to_hbm [thread:$0]  %s63_s21, 128, %s65_s24, [#allocation7]  }
  0x19   :  { %158 = dma.done.wait [#allocation4], 128  }
  0x1a   :  { %159 = vsyncadd [#allocation4], 4294967168 }
  0x1b   :  { %160 = dma.done.wait [#allocation7], 128  }
  0x1c   :  { %161 = vsyncadd [#allocation7], 4294967168 }
  0x1d   :  { %76 = vsyncpa [#allocation3], 1 }
  0x1e   :  { %77 = vsyncpa [#allocation4], 1 }
  0x1f   :  { %78 = vsyncpa [#allocation7], 1 }

</bundles_post_ra>
